<compile_context>
chip_gen: v7x
topology: tpu7x:2x2x1
jax: 0.10.0
libtpu: 0.0.40
codegen_flags: <defaults>
</compile_context>

<pallas_src>
import functools

import jax
import jax.numpy as jnp
from jax import lax
from jax.experimental import pallas as pl
from jax.experimental.pallas import tpu as pltpu

_LANE = 128
_MAX_TIME_CHUNK = 64            # per-grid-step time extent cap (multiple of 8)
_VMEM_DYN_BUDGET = 16 * 2 ** 20  # budget for pipelined blocks + xp scratch


def _round_up(x, m):
    return (x + m - 1) // m * m


def _pick_time_chunk(T, bb, I, Hp):
    """Largest multiple-of-8 time chunk that keeps the double-buffered x/out
    blocks plus the xp scratch under the dynamic VMEM budget (v5e's 16 MiB
    scoped default / v7x's 64 MiB physical are the tight cases)."""
    per_tc = 2 * (bb * I * 2 + bb * Hp * 4) + bb * Hp * 4
    tc_budget = max(8, (_VMEM_DYN_BUDGET // per_tc) // 8 * 8)
    return int(min(_MAX_TIME_CHUNK, tc_budget, _round_up(T, 8)))


def _rnn_chunk_kernel(x_ref, h0_ref, wx_ref, b_ref, wh12_ref, out_ref,
                      xp_ref, h_ref, *, tc, hp, forward, unroll):
    """One (batch-block, time-chunk) grid step.

    x_ref   : (bb, tc, I)   bf16  raw inputs for this chunk
    h0_ref  : (bb, Hp)      f32   initial hidden state for this batch block
    wx_ref  : (I, Hp)       bf16  input->hidden weight (VMEM resident)
    b_ref   : (1, Hp)       f32   bias (VMEM resident)
    wh12_ref: (Hp, 2*Hp)    bf16  [Wh | Wh^2] (VMEM resident)
    out_ref : (bb, tc, Hp)  f32   hidden states, stored in visit order
    xp_ref  : (bb, tc, Hp)  f32   scratch: pre-projected inputs for the chunk
    h_ref   : (bb, Hp)      f32   scratch: hidden state carried across chunks
    """
    c = pl.program_id(1)

    @pl.when(c == 0)
    def _():
        h_ref[...] = h0_ref[...]

    bb = x_ref.shape[0]

    # --- time-parallel part (off the serial critical path): fused input
    # projection for the whole chunk, u_t = x_t @ Wx + b. bf16 MXU, f32 acc.
    wx = wx_ref[...]
    bias = b_ref[...]
    for bi in range(bb):  # static unrolled loop over batch rows (bb is small)
        xp_ref[bi] = (jnp.dot(x_ref[bi], wx, preferred_element_type=jnp.float32)
                      + bias)

    wh12 = wh12_ref[...]          # (Hp, 2Hp) bf16, loaded once per chunk
    wh1 = wh12[:, :hp]            # Wh (first Hp columns), static slice

    # --- serial part: advance TWO timesteps per carried MXU round-trip.
    # Visit-order index j = 2s, 2s+1; storage index i = j (fwd) or tc-1-j (bwd);
    # stores always go to visit order (PyTorch append order).
    def pair_step(s, h):
        if forward:
            i0, i1 = 2 * s, 2 * s + 1
        else:
            i0, i1 = tc - 1 - 2 * s, tc - 2 - 2 * s
        u0 = xp_ref[:, i0, :]                                   # (bb, Hp) f32
        u1 = xp_ref[:, i1, :]
        hw = jnp.dot(h.astype(jnp.bfloat16), wh12,
                     preferred_element_type=jnp.float32)        # (bb, 2Hp)
        u0w = jnp.dot(u0.astype(jnp.bfloat16), wh1,
                      preferred_element_type=jnp.float32)       # (bb, Hp)
        h1 = u0 + hw[:, :hp]                                    # h_{j}
        h2 = u1 + u0w + hw[:, hp:]                              # h_{j+1}
        out_ref[:, 2 * s, :] = h1
        out_ref[:, 2 * s + 1, :] = h2
        return h2

    h_ref[...] = lax.fori_loop(0, tc // 2, pair_step, h_ref[...],
                               unroll=unroll)


@functools.partial(jax.jit, static_argnames=("direction",))
def rnn_sublayer_forward(input_seq, hidden, weight, bias, direction=1):
    """input_seq: (B, T, I); hidden: (B, H); weight: (H, I+H) (nn.Linear
    layout); bias: (H,).  Returns (B, T, H) f32 in PyTorch append order."""
    B, T, I = input_seq.shape
    H = hidden.shape[1]
    Hp = _round_up(max(H, 1), _LANE)
    forward = (direction == 1)

    # Batch blocking for the megacore 'parallel' axis (bb == B for small B).
    bb = 8 if (B % 8 == 0 and B >= 16) else B
    nb = B // bb

    tc = _pick_time_chunk(T, bb, I, Hp)
    Tp = _round_up(T, tc)
    nc = Tp // tc

    # nn.Linear weight split into right-multiplication form:
    #   h' = x @ Wx + h @ Wh + b , zero-padded to lane-dense Hp.
    w_x = weight[:, :I].T                                    # (I, H)
    w_h = weight[:, I:].T                                    # (H, H)
    wx_p = (jnp.zeros((I, Hp), jnp.float32).at[:, :H].set(w_x)
            .astype(jnp.bfloat16))
    wh_p = jnp.zeros((Hp, Hp), jnp.float32).at[:H, :H].set(w_h)
    wh2_p = jnp.dot(wh_p, wh_p, precision=lax.Precision.HIGHEST)
    wh12_p = jnp.concatenate([wh_p, wh2_p], axis=1).astype(jnp.bfloat16)
    b_p = jnp.zeros((1, Hp), jnp.float32).at[0, :H].set(bias)
    h0_p = jnp.zeros((B, Hp), jnp.float32).at[:, :H].set(
        hidden.astype(jnp.float32))

    # Stream x as bf16 (it is an MXU operand anyway).  Zero-pad the time axis
    # to a multiple of tc: END for forward, FRONT for backward, so the padded
    # steps are always visited last and never corrupt real outputs.
    x_bf = input_seq.astype(jnp.bfloat16)
    if Tp > T:
        pad = Tp - T
        tpad = (0, pad) if forward else (pad, 0)
        x_bf = jnp.pad(x_bf, ((0, 0), tpad, (0, 0)))

    if forward:
        x_map = lambda b, c: (b, c, 0)
    else:
        # Reversed chunk order via the index_map (free); in-chunk reversal is
        # handled by the kernel's storage indices.
        x_map = lambda b, c: (b, nc - 1 - c, 0)

    kernel = functools.partial(_rnn_chunk_kernel, tc=tc, hp=Hp,
                               forward=forward, unroll=(tc // 2 <= 32))

    vmem_bytes = (
        2 * (bb * tc * I * 2)            # x chunk, double buffered (bf16)
        + 2 * (bb * tc * Hp * 4)         # out chunk, double buffered (f32)
        + 2 * (bb * Hp * 4)              # h0 block, double buffered
        + bb * tc * Hp * 4               # xp scratch
        + bb * Hp * 4                    # h carry scratch
        + I * Hp * 2 + Hp * 2 * Hp * 2 + Hp * 4   # VMEM-resident Wx, [Wh|Wh2], b
    )
    vmem_limit = int(min(64 * 2 ** 20, max(32 * 2 ** 20, 2 * vmem_bytes)))

    out = pl.pallas_call(
        kernel,
        out_shape=jax.ShapeDtypeStruct((B, Tp, Hp), jnp.float32),
        grid=(nb, nc),
        in_specs=[
            pl.BlockSpec((bb, tc, I), x_map),                    # raw x chunk
            pl.BlockSpec((bb, Hp), lambda b, c: (b, 0)),         # h0 block
            pl.BlockSpec(memory_space=pltpu.MemorySpace.VMEM),   # Wx (resident)
            pl.BlockSpec(memory_space=pltpu.MemorySpace.VMEM),   # bias
            pl.BlockSpec(memory_space=pltpu.MemorySpace.VMEM),   # [Wh | Wh^2]
        ],
        out_specs=pl.BlockSpec((bb, tc, Hp), lambda b, c: (b, c, 0)),
        scratch_shapes=[
            pltpu.VMEM((bb, tc, Hp), jnp.float32),               # xp scratch
            pltpu.VMEM((bb, Hp), jnp.float32),                   # h carry
        ],
        compiler_params=pltpu.CompilerParams(
            dimension_semantics=("parallel", "arbitrary"),
            vmem_limit_bytes=vmem_limit,
        ),
    )(x_bf, h0_p, wx_p, b_p, wh12_p)

    # Drop time padding and the lane padding of the hidden dim.
    return out[:, :T, :H]


def _reference_forward(input_seq, hidden, weight, bias, direction=1):
    """PyTorch-faithful pure-f32 replica of RNNSubLayer.forward."""
    _, T, I = input_seq.shape
    w_x = weight[:, :I].T
    w_h = weight[:, I:].T
    idxs = range(T) if direction == 1 else range(T - 1, -1, -1)
    h = hidden.astype(jnp.float32)
    outs = []
    for i in idxs:
        h = (jnp.dot(input_seq[:, i, :], w_x, precision=lax.Precision.HIGHEST)
             + jnp.dot(h, w_h, precision=lax.Precision.HIGHEST)
             + bias)
        outs.append(h[:, None, :])
    return jnp.concatenate(outs, axis=1)


if __name__ == "__main__":
    batch, input_size, hidden_size = 2, 16, 32

    key = jax.random.PRNGKey(0)
    k_x, k_h, k_w, k_b = jax.random.split(key, 4)

    fan_in = input_size + hidden_size
    bound = 1.0 / (fan_in ** 0.5)
    weight = jax.random.uniform(
        k_w, (hidden_size, fan_in), minval=-bound, maxval=bound,
        dtype=jnp.float32)
    bias = jax.random.uniform(
        k_b, (hidden_size,), minval=-bound, maxval=bound, dtype=jnp.float32)
    h0 = 0.5 * jax.random.normal(k_h, (batch, hidden_size), dtype=jnp.float32)

    # seq_len=8 exercises the no-padding path; seq_len=5 exercises time padding
    # (end-padded for direction=1, front-padded for direction=-1).
    for seq_len in (8, 5):
        x = jax.random.normal(k_x, (batch, seq_len, input_size),
                              dtype=jnp.float32)
        for direction in (1, -1):
            out = jax.block_until_ready(
                rnn_sublayer_forward(x, h0, weight, bias, direction=direction))
            ref = _reference_forward(x, h0, weight, bias, direction)
            assert out.shape == (batch, seq_len, hidden_size)
            err = float(jnp.max(jnp.abs(out - ref)))
            # Tolerance covers bf16 MXU operand rounding plus the k=2 [Wh|Wh^2]
            # reassociation; a real indexing/direction bug would be O(1).
            assert jnp.allclose(out, ref, atol=3e-2, rtol=2e-2), (
                seq_len, direction, err)

    print("KERNEL_OK")
</pallas_src>

<mosaic_0001>
module attributes {stable_mosaic.version = 11 : i64} {
  func.func @_rnn_chunk_kernel(%arg0: i32, %arg1: i32, %arg2: memref<2x8x16xbf16, #tpu.memory_space<vmem>>, %arg3: memref<2x128xf32, #tpu.memory_space<vmem>>, %arg4: memref<16x128xbf16, #tpu.memory_space<vmem>>, %arg5: memref<1x128xf32, #tpu.memory_space<vmem>>, %arg6: memref<128x256xbf16, #tpu.memory_space<vmem>>, %arg7: memref<2x8x128xf32, #tpu.memory_space<vmem>>, %arg8: memref<2x8x128xf32, #tpu.memory_space<vmem>>, %arg9: memref<2x128xf32, #tpu.memory_space<vmem>>) attributes {dimension_semantics = [#tpu.dimension_semantics<parallel>, #tpu.dimension_semantics<arbitrary>], iteration_bounds = array<i64: 1, 1>, scalar_prefetch = 0 : i64, scratch_operands = 2 : i64, tpu.core_type = #tpu.core_type<tc>, window_params = [{transform_indices = @transform_0, window_bounds = array<i64: 2, 8, 16>}, {transform_indices = @transform_1, window_bounds = array<i64: 2, 128>}, {pipeline_mode = #tpu.pipeline_mode<synchronous>, transform_indices = @transform_2, window_bounds = array<i64: 16, 128>}, {pipeline_mode = #tpu.pipeline_mode<synchronous>, transform_indices = @transform_3, window_bounds = array<i64: 1, 128>}, {pipeline_mode = #tpu.pipeline_mode<synchronous>, transform_indices = @transform_4, window_bounds = array<i64: 128, 256>}, {transform_indices = @transform_5, window_bounds = array<i64: 2, 8, 128>}]} {
    %c0_i32 = arith.constant 0 : i32
    %0 = arith.cmpi eq, %arg1, %c0_i32 : i32
    %1 = arith.extui %0 : i1 to i32
    %c0_i32_0 = arith.constant 0 : i32
    %2 = arith.cmpi ne, %1, %c0_i32_0 : i32
    scf.if %2 {
      %c0_87 = arith.constant 0 : index
      %c0_88 = arith.constant 0 : index
      %141 = vector.load %arg3[%c0_87, %c0_88] : memref<2x128xf32, #tpu.memory_space<vmem>>, vector<2x128xf32>
      %c0_89 = arith.constant 0 : index
      %c0_90 = arith.constant 0 : index
      %142 = vector.load %arg9[%c0_89, %c0_90] : memref<2x128xf32, #tpu.memory_space<vmem>>, vector<2x128xf32>
      tpu.vector_store %arg9[%c0_89, %c0_90], %141 {strides = array<i32>} : memref<2x128xf32, #tpu.memory_space<vmem>>, vector<2x128xf32>,
    } else {
    }
    %c0 = arith.constant 0 : index
    %c0_1 = arith.constant 0 : index
    %3 = vector.load %arg4[%c0, %c0_1] : memref<16x128xbf16, #tpu.memory_space<vmem>>, vector<16x128xbf16>
    %c0_2 = arith.constant 0 : index
    %c0_3 = arith.constant 0 : index
    %4 = vector.load %arg5[%c0_2, %c0_3] : memref<1x128xf32, #tpu.memory_space<vmem>>, vector<1x128xf32>
    %c0_4 = arith.constant 0 : index
    %c0_5 = arith.constant 0 : index
    %c0_6 = arith.constant 0 : index
    %5 = vector.load %arg2[%c0_4, %c0_5, %c0_6] : memref<2x8x16xbf16, #tpu.memory_space<vmem>>, vector<1x8x16xbf16>
    %6 = vector.shape_cast %5 : vector<1x8x16xbf16> to vector<8x16xbf16>
    %cst = arith.constant dense<0.000000e+00> : vector<8x128xf32>
    %7 = tpu.matmul %6, %3, %cst {dimension_numbers = #tpu.dot_dimension_numbers<[1], [0], [0], [1], [0, 0, 1, 1], [], []>} : vector<8x16xbf16>, vector<16x128xbf16>, vector<8x128xf32> -> vector<8x128xf32>
    %8 = vector.broadcast %4 : vector<1x128xf32> to vector<8x128xf32>
    %9 = arith.addf %7, %8 : vector<8x128xf32>
    %c0_7 = arith.constant 0 : index
    %c0_8 = arith.constant 0 : index
    %c0_9 = arith.constant 0 : index
    %10 = vector.load %arg8[%c0_7, %c0_8, %c0_9] : memref<2x8x128xf32, #tpu.memory_space<vmem>>, vector<1x8x128xf32>
    %11 = vector.shape_cast %10 : vector<1x8x128xf32> to vector<8x128xf32>
    %12 = vector.shape_cast %9 : vector<8x128xf32> to vector<1x8x128xf32>
    tpu.vector_store %arg8[%c0_7, %c0_8, %c0_9], %12 {strides = array<i32>} : memref<2x8x128xf32, #tpu.memory_space<vmem>>, vector<1x8x128xf32>,
    %c1 = arith.constant 1 : index
    %c0_10 = arith.constant 0 : index
    %c0_11 = arith.constant 0 : index
    %13 = vector.load %arg2[%c1, %c0_10, %c0_11] : memref<2x8x16xbf16, #tpu.memory_space<vmem>>, vector<1x8x16xbf16>
    %14 = vector.shape_cast %13 : vector<1x8x16xbf16> to vector<8x16xbf16>
    %cst_12 = arith.constant dense<0.000000e+00> : vector<8x128xf32>
    %15 = tpu.matmul %14, %3, %cst_12 {dimension_numbers = #tpu.dot_dimension_numbers<[1], [0], [0], [1], [0, 0, 1, 1], [], []>} : vector<8x16xbf16>, vector<16x128xbf16>, vector<8x128xf32> -> vector<8x128xf32>
    %16 = vector.broadcast %4 : vector<1x128xf32> to vector<8x128xf32>
    %17 = arith.addf %15, %16 : vector<8x128xf32>
    %c1_13 = arith.constant 1 : index
    %c0_14 = arith.constant 0 : index
    %c0_15 = arith.constant 0 : index
    %18 = vector.load %arg8[%c1_13, %c0_14, %c0_15] : memref<2x8x128xf32, #tpu.memory_space<vmem>>, vector<1x8x128xf32>
    %19 = vector.shape_cast %18 : vector<1x8x128xf32> to vector<8x128xf32>
    %20 = vector.shape_cast %17 : vector<8x128xf32> to vector<1x8x128xf32>
    tpu.vector_store %arg8[%c1_13, %c0_14, %c0_15], %20 {strides = array<i32>} : memref<2x8x128xf32, #tpu.memory_space<vmem>>, vector<1x8x128xf32>,
    %c0_16 = arith.constant 0 : index
    %c0_17 = arith.constant 0 : index
    %21 = vector.load %arg6[%c0_16, %c0_17] : memref<128x256xbf16, #tpu.memory_space<vmem>>, vector<128x256xbf16>
    %22 = vector.extract_strided_slice %21 {offsets = [0, 0], sizes = [128, 128], strides = [1, 1]} : vector<128x256xbf16> to vector<128x128xbf16>
    %c0_18 = arith.constant 0 : index
    %c0_19 = arith.constant 0 : index
    %23 = vector.load %arg9[%c0_18, %c0_19] : memref<2x128xf32, #tpu.memory_space<vmem>>, vector<2x128xf32>
    %c0_i32_20 = arith.constant 0 : i32
    %c2_i32 = arith.constant 2 : i32
    %24 = arith.muli %c2_i32, %c0_i32_20 : i32
    %c2_i32_21 = arith.constant 2 : i32
    %25 = arith.muli %c2_i32_21, %c0_i32_20 : i32
    %c1_i32 = arith.constant 1 : i32
    %26 = arith.addi %25, %c1_i32 : i32
    %c0_22 = arith.constant 0 : index
    %27 = arith.index_cast %24 : i32 to index
    %c0_23 = arith.constant 0 : index
    %28 = vector.load %arg8[%c0_22, %27, %c0_23] : memref<2x8x128xf32, #tpu.memory_space<vmem>>, vector<2x1x128xf32>
    %29 = vector.shape_cast %28 : vector<2x1x128xf32> to vector<2x128xf32>
    %c0_24 = arith.constant 0 : index
    %30 = arith.index_cast %26 : i32 to index
    %c0_25 = arith.constant 0 : index
    %31 = vector.load %arg8[%c0_24, %30, %c0_25] : memref<2x8x128xf32, #tpu.memory_space<vmem>>, vector<2x1x128xf32>
    %32 = vector.shape_cast %31 : vector<2x1x128xf32> to vector<2x128xf32>
    %33 = arith.truncf %23 : vector<2x128xf32> to vector<2x128xbf16>
    %cst_26 = arith.constant dense<0.000000e+00> : vector<2x256xf32>
    %34 = tpu.matmul %33, %21, %cst_26 {dimension_numbers = #tpu.dot_dimension_numbers<[1], [0], [0], [1], [0, 0, 1, 1], [], []>} : vector<2x128xbf16>, vector<128x256xbf16>, vector<2x256xf32> -> vector<2x256xf32>
    %35 = arith.truncf %29 : vector<2x128xf32> to vector<2x128xbf16>
    %cst_27 = arith.constant dense<0.000000e+00> : vector<2x128xf32>
    %36 = tpu.matmul %35, %22, %cst_27 {dimension_numbers = #tpu.dot_dimension_numbers<[1], [0], [0], [1], [0, 0, 1, 1], [], []>} : vector<2x128xbf16>, vector<128x128xbf16>, vector<2x128xf32> -> vector<2x128xf32>
    %37 = vector.extract_strided_slice %34 {offsets = [0, 0], sizes = [2, 128], strides = [1, 1]} : vector<2x256xf32> to vector<2x128xf32>
    %38 = arith.addf %29, %37 : vector<2x128xf32>
    %39 = arith.addf %32, %36 : vector<2x128xf32>
    %40 = vector.extract_strided_slice %34 {offsets = [0, 128], sizes = [2, 128], strides = [1, 1]} : vector<2x256xf32> to vector<2x128xf32>
    %41 = arith.addf %39, %40 : vector<2x128xf32>
    %c2_i32_28 = arith.constant 2 : i32
    %42 = arith.muli %c2_i32_28, %c0_i32_20 : i32
    %c0_29 = arith.constant 0 : index
    %43 = arith.index_cast %42 : i32 to index
    %c0_30 = arith.constant 0 : index
    %44 = vector.load %arg7[%c0_29, %43, %c0_30] : memref<2x8x128xf32, #tpu.memory_space<vmem>>, vector<2x1x128xf32>
    %45 = vector.shape_cast %44 : vector<2x1x128xf32> to vector<2x128xf32>
    %46 = vector.shape_cast %38 : vector<2x128xf32> to vector<2x1x128xf32>
    tpu.vector_store %arg7[%c0_29, %43, %c0_30], %46 {strides = array<i32>} : memref<2x8x128xf32, #tpu.memory_space<vmem>>, vector<2x1x128xf32>,
    %c2_i32_31 = arith.constant 2 : i32
    %47 = arith.muli %c2_i32_31, %c0_i32_20 : i32
    %c1_i32_32 = arith.constant 1 : i32
    %48 = arith.addi %47, %c1_i32_32 : i32
    %c0_33 = arith.constant 0 : index
    %49 = arith.index_cast %48 : i32 to index
    %c0_34 = arith.constant 0 : index
    %50 = vector.load %arg7[%c0_33, %49, %c0_34] : memref<2x8x128xf32, #tpu.memory_space<vmem>>, vector<2x1x128xf32>
    %51 = vector.shape_cast %50 : vector<2x1x128xf32> to vector<2x128xf32>
    %52 = vector.shape_cast %41 : vector<2x128xf32> to vector<2x1x128xf32>
    tpu.vector_store %arg7[%c0_33, %49, %c0_34], %52 {strides = array<i32>} : memref<2x8x128xf32, #tpu.memory_space<vmem>>, vector<2x1x128xf32>,
    %c1_i32_35 = arith.constant 1 : i32
    %c2_i32_36 = arith.constant 2 : i32
    %53 = arith.muli %c2_i32_36, %c1_i32_35 : i32
    %c2_i32_37 = arith.constant 2 : i32
    %54 = arith.muli %c2_i32_37, %c1_i32_35 : i32
    %c1_i32_38 = arith.constant 1 : i32
    %55 = arith.addi %54, %c1_i32_38 : i32
    %c0_39 = arith.constant 0 : index
    %56 = arith.index_cast %53 : i32 to index
    %c0_40 = arith.constant 0 : index
    %57 = vector.load %arg8[%c0_39, %56, %c0_40] : memref<2x8x128xf32, #tpu.memory_space<vmem>>, vector<2x1x128xf32>
    %58 = vector.shape_cast %57 : vector<2x1x128xf32> to vector<2x128xf32>
    %c0_41 = arith.constant 0 : index
    %59 = arith.index_cast %55 : i32 to index
    %c0_42 = arith.constant 0 : index
    %60 = vector.load %arg8[%c0_41, %59, %c0_42] : memref<2x8x128xf32, #tpu.memory_space<vmem>>, vector<2x1x128xf32>
    %61 = vector.shape_cast %60 : vector<2x1x128xf32> to vector<2x128xf32>
    %62 = arith.truncf %41 : vector<2x128xf32> to vector<2x128xbf16>
    %cst_43 = arith.constant dense<0.000000e+00> : vector<2x256xf32>
    %63 = tpu.matmul %62, %21, %cst_43 {dimension_numbers = #tpu.dot_dimension_numbers<[1], [0], [0], [1], [0, 0, 1, 1], [], []>} : vector<2x128xbf16>, vector<128x256xbf16>, vector<2x256xf32> -> vector<2x256xf32>
    %64 = arith.truncf %58 : vector<2x128xf32> to vector<2x128xbf16>
    %cst_44 = arith.constant dense<0.000000e+00> : vector<2x128xf32>
    %65 = tpu.matmul %64, %22, %cst_44 {dimension_numbers = #tpu.dot_dimension_numbers<[1], [0], [0], [1], [0, 0, 1, 1], [], []>} : vector<2x128xbf16>, vector<128x128xbf16>, vector<2x128xf32> -> vector<2x128xf32>
    %66 = vector.extract_strided_slice %63 {offsets = [0, 0], sizes = [2, 128], strides = [1, 1]} : vector<2x256xf32> to vector<2x128xf32>
    %67 = arith.addf %58, %66 : vector<2x128xf32>
    %68 = arith.addf %61, %65 : vector<2x128xf32>
    %69 = vector.extract_strided_slice %63 {offsets = [0, 128], sizes = [2, 128], strides = [1, 1]} : vector<2x256xf32> to vector<2x128xf32>
    %70 = arith.addf %68, %69 : vector<2x128xf32>
    %c2_i32_45 = arith.constant 2 : i32
    %71 = arith.muli %c2_i32_45, %c1_i32_35 : i32
    %c0_46 = arith.constant 0 : index
    %72 = arith.index_cast %71 : i32 to index
    %c0_47 = arith.constant 0 : index
    %73 = vector.load %arg7[%c0_46, %72, %c0_47] : memref<2x8x128xf32, #tpu.memory_space<vmem>>, vector<2x1x128xf32>
    %74 = vector.shape_cast %73 : vector<2x1x128xf32> to vector<2x128xf32>
    %75 = vector.shape_cast %67 : vector<2x128xf32> to vector<2x1x128xf32>
    tpu.vector_store %arg7[%c0_46, %72, %c0_47], %75 {strides = array<i32>} : memref<2x8x128xf32, #tpu.memory_space<vmem>>, vector<2x1x128xf32>,
    %c2_i32_48 = arith.constant 2 : i32
    %76 = arith.muli %c2_i32_48, %c1_i32_35 : i32
    %c1_i32_49 = arith.constant 1 : i32
    %77 = arith.addi %76, %c1_i32_49 : i32
    %c0_50 = arith.constant 0 : index
    %78 = arith.index_cast %77 : i32 to index
    %c0_51 = arith.constant 0 : index
    %79 = vector.load %arg7[%c0_50, %78, %c0_51] : memref<2x8x128xf32, #tpu.memory_space<vmem>>, vector<2x1x128xf32>
    %80 = vector.shape_cast %79 : vector<2x1x128xf32> to vector<2x128xf32>
    %81 = vector.shape_cast %70 : vector<2x128xf32> to vector<2x1x128xf32>
    tpu.vector_store %arg7[%c0_50, %78, %c0_51], %81 {strides = array<i32>} : memref<2x8x128xf32, #tpu.memory_space<vmem>>, vector<2x1x128xf32>,
    %c2_i32_52 = arith.constant 2 : i32
    %c2_i32_53 = arith.constant 2 : i32
    %82 = arith.muli %c2_i32_53, %c2_i32_52 : i32
    %c2_i32_54 = arith.constant 2 : i32
    %83 = arith.muli %c2_i32_54, %c2_i32_52 : i32
    %c1_i32_55 = arith.constant 1 : i32
    %84 = arith.addi %83, %c1_i32_55 : i32
    %c0_56 = arith.constant 0 : index
    %85 = arith.index_cast %82 : i32 to index
    %c0_57 = arith.constant 0 : index
    %86 = vector.load %arg8[%c0_56, %85, %c0_57] : memref<2x8x128xf32, #tpu.memory_space<vmem>>, vector<2x1x128xf32>
    %87 = vector.shape_cast %86 : vector<2x1x128xf32> to vector<2x128xf32>
    %c0_58 = arith.constant 0 : index
    %88 = arith.index_cast %84 : i32 to index
    %c0_59 = arith.constant 0 : index
    %89 = vector.load %arg8[%c0_58, %88, %c0_59] : memref<2x8x128xf32, #tpu.memory_space<vmem>>, vector<2x1x128xf32>
    %90 = vector.shape_cast %89 : vector<2x1x128xf32> to vector<2x128xf32>
    %91 = arith.truncf %70 : vector<2x128xf32> to vector<2x128xbf16>
    %cst_60 = arith.constant dense<0.000000e+00> : vector<2x256xf32>
    %92 = tpu.matmul %91, %21, %cst_60 {dimension_numbers = #tpu.dot_dimension_numbers<[1], [0], [0], [1], [0, 0, 1, 1], [], []>} : vector<2x128xbf16>, vector<128x256xbf16>, vector<2x256xf32> -> vector<2x256xf32>
    %93 = arith.truncf %87 : vector<2x128xf32> to vector<2x128xbf16>
    %cst_61 = arith.constant dense<0.000000e+00> : vector<2x128xf32>
    %94 = tpu.matmul %93, %22, %cst_61 {dimension_numbers = #tpu.dot_dimension_numbers<[1], [0], [0], [1], [0, 0, 1, 1], [], []>} : vector<2x128xbf16>, vector<128x128xbf16>, vector<2x128xf32> -> vector<2x128xf32>
    %95 = vector.extract_strided_slice %92 {offsets = [0, 0], sizes = [2, 128], strides = [1, 1]} : vector<2x256xf32> to vector<2x128xf32>
    %96 = arith.addf %87, %95 : vector<2x128xf32>
    %97 = arith.addf %90, %94 : vector<2x128xf32>
    %98 = vector.extract_strided_slice %92 {offsets = [0, 128], sizes = [2, 128], strides = [1, 1]} : vector<2x256xf32> to vector<2x128xf32>
    %99 = arith.addf %97, %98 : vector<2x128xf32>
    %c2_i32_62 = arith.constant 2 : i32
    %100 = arith.muli %c2_i32_62, %c2_i32_52 : i32
    %c0_63 = arith.constant 0 : index
    %101 = arith.index_cast %100 : i32 to index
    %c0_64 = arith.constant 0 : index
    %102 = vector.load %arg7[%c0_63, %101, %c0_64] : memref<2x8x128xf32, #tpu.memory_space<vmem>>, vector<2x1x128xf32>
    %103 = vector.shape_cast %102 : vector<2x1x128xf32> to vector<2x128xf32>
    %104 = vector.shape_cast %96 : vector<2x128xf32> to vector<2x1x128xf32>
    tpu.vector_store %arg7[%c0_63, %101, %c0_64], %104 {strides = array<i32>} : memref<2x8x128xf32, #tpu.memory_space<vmem>>, vector<2x1x128xf32>,
    %c2_i32_65 = arith.constant 2 : i32
    %105 = arith.muli %c2_i32_65, %c2_i32_52 : i32
    %c1_i32_66 = arith.constant 1 : i32
    %106 = arith.addi %105, %c1_i32_66 : i32
    %c0_67 = arith.constant 0 : index
    %107 = arith.index_cast %106 : i32 to index
    %c0_68 = arith.constant 0 : index
    %108 = vector.load %arg7[%c0_67, %107, %c0_68] : memref<2x8x128xf32, #tpu.memory_space<vmem>>, vector<2x1x128xf32>
    %109 = vector.shape_cast %108 : vector<2x1x128xf32> to vector<2x128xf32>
    %110 = vector.shape_cast %99 : vector<2x128xf32> to vector<2x1x128xf32>
    tpu.vector_store %arg7[%c0_67, %107, %c0_68], %110 {strides = array<i32>} : memref<2x8x128xf32, #tpu.memory_space<vmem>>, vector<2x1x128xf32>,
    %c3_i32 = arith.constant 3 : i32
    %c2_i32_69 = arith.constant 2 : i32
    %111 = arith.muli %c2_i32_69, %c3_i32 : i32
    %c2_i32_70 = arith.constant 2 : i32
    %112 = arith.muli %c2_i32_70, %c3_i32 : i32
    %c1_i32_71 = arith.constant 1 : i32
    %113 = arith.addi %112, %c1_i32_71 : i32
    %c0_72 = arith.constant 0 : index
    %114 = arith.index_cast %111 : i32 to index
    %c0_73 = arith.constant 0 : index
    %115 = vector.load %arg8[%c0_72, %114, %c0_73] : memref<2x8x128xf32, #tpu.memory_space<vmem>>, vector<2x1x128xf32>
    %116 = vector.shape_cast %115 : vector<2x1x128xf32> to vector<2x128xf32>
    %c0_74 = arith.constant 0 : index
    %117 = arith.index_cast %113 : i32 to index
    %c0_75 = arith.constant 0 : index
    %118 = vector.load %arg8[%c0_74, %117, %c0_75] : memref<2x8x128xf32, #tpu.memory_space<vmem>>, vector<2x1x128xf32>
    %119 = vector.shape_cast %118 : vector<2x1x128xf32> to vector<2x128xf32>
    %120 = arith.truncf %99 : vector<2x128xf32> to vector<2x128xbf16>
    %cst_76 = arith.constant dense<0.000000e+00> : vector<2x256xf32>
    %121 = tpu.matmul %120, %21, %cst_76 {dimension_numbers = #tpu.dot_dimension_numbers<[1], [0], [0], [1], [0, 0, 1, 1], [], []>} : vector<2x128xbf16>, vector<128x256xbf16>, vector<2x256xf32> -> vector<2x256xf32>
    %122 = arith.truncf %116 : vector<2x128xf32> to vector<2x128xbf16>
    %cst_77 = arith.constant dense<0.000000e+00> : vector<2x128xf32>
    %123 = tpu.matmul %122, %22, %cst_77 {dimension_numbers = #tpu.dot_dimension_numbers<[1], [0], [0], [1], [0, 0, 1, 1], [], []>} : vector<2x128xbf16>, vector<128x128xbf16>, vector<2x128xf32> -> vector<2x128xf32>
    %124 = vector.extract_strided_slice %121 {offsets = [0, 0], sizes = [2, 128], strides = [1, 1]} : vector<2x256xf32> to vector<2x128xf32>
    %125 = arith.addf %116, %124 : vector<2x128xf32>
    %126 = arith.addf %119, %123 : vector<2x128xf32>
    %127 = vector.extract_strided_slice %121 {offsets = [0, 128], sizes = [2, 128], strides = [1, 1]} : vector<2x256xf32> to vector<2x128xf32>
    %128 = arith.addf %126, %127 : vector<2x128xf32>
    %c2_i32_78 = arith.constant 2 : i32
    %129 = arith.muli %c2_i32_78, %c3_i32 : i32
    %c0_79 = arith.constant 0 : index
    %130 = arith.index_cast %129 : i32 to index
    %c0_80 = arith.constant 0 : index
    %131 = vector.load %arg7[%c0_79, %130, %c0_80] : memref<2x8x128xf32, #tpu.memory_space<vmem>>, vector<2x1x128xf32>
    %132 = vector.shape_cast %131 : vector<2x1x128xf32> to vector<2x128xf32>
    %133 = vector.shape_cast %125 : vector<2x128xf32> to vector<2x1x128xf32>
    tpu.vector_store %arg7[%c0_79, %130, %c0_80], %133 {strides = array<i32>} : memref<2x8x128xf32, #tpu.memory_space<vmem>>, vector<2x1x128xf32>,
    %c2_i32_81 = arith.constant 2 : i32
    %134 = arith.muli %c2_i32_81, %c3_i32 : i32
    %c1_i32_82 = arith.constant 1 : i32
    %135 = arith.addi %134, %c1_i32_82 : i32
    %c0_83 = arith.constant 0 : index
    %136 = arith.index_cast %135 : i32 to index
    %c0_84 = arith.constant 0 : index
    %137 = vector.load %arg7[%c0_83, %136, %c0_84] : memref<2x8x128xf32, #tpu.memory_space<vmem>>, vector<2x1x128xf32>
    %138 = vector.shape_cast %137 : vector<2x1x128xf32> to vector<2x128xf32>
    %139 = vector.shape_cast %128 : vector<2x128xf32> to vector<2x1x128xf32>
    tpu.vector_store %arg7[%c0_83, %136, %c0_84], %139 {strides = array<i32>} : memref<2x8x128xf32, #tpu.memory_space<vmem>>, vector<2x1x128xf32>,
    %c4_i32 = arith.constant 4 : i32
    %c0_85 = arith.constant 0 : index
    %c0_86 = arith.constant 0 : index
    %140 = vector.load %arg9[%c0_85, %c0_86] : memref<2x128xf32, #tpu.memory_space<vmem>>, vector<2x128xf32>
    tpu.vector_store %arg9[%c0_85, %c0_86], %128 {strides = array<i32>} : memref<2x128xf32, #tpu.memory_space<vmem>>, vector<2x128xf32>,
    return
  }
  func.func @transform_0(%arg0: i32, %arg1: i32) -> (i32, i32, i32) {
    %c0_i32 = arith.constant 0 : i32
    %c0_i32_0 = arith.constant 0 : i32
    return %arg0, %arg1, %c0_i32 : i32, i32, i32
  }
  func.func @transform_1(%arg0: i32, %arg1: i32) -> (i32, i32) {
    %c0_i32 = arith.constant 0 : i32
    %c0_i32_0 = arith.constant 0 : i32
    return %arg0, %c0_i32 : i32, i32
  }
  func.func @transform_2(%arg0: i32, %arg1: i32) -> (i32, i32) {
    %c0_i32 = arith.constant 0 : i32
    %c0_i32_0 = arith.constant 0 : i32
    %c0_i32_1 = arith.constant 0 : i32
    return %c0_i32, %c0_i32_0 : i32, i32
  }
  func.func @transform_3(%arg0: i32, %arg1: i32) -> (i32, i32) {
    %c0_i32 = arith.constant 0 : i32
    %c0_i32_0 = arith.constant 0 : i32
    %c0_i32_1 = arith.constant 0 : i32
    return %c0_i32, %c0_i32_0 : i32, i32
  }
  func.func @transform_4(%arg0: i32, %arg1: i32) -> (i32, i32) {
    %c0_i32 = arith.constant 0 : i32
    %c0_i32_0 = arith.constant 0 : i32
    %c0_i32_1 = arith.constant 0 : i32
    return %c0_i32, %c0_i32_0 : i32, i32
  }
  func.func @transform_5(%arg0: i32, %arg1: i32) -> (i32, i32, i32) {
    %c0_i32 = arith.constant 0 : i32
    %c0_i32_0 = arith.constant 0 : i32
    return %arg0, %arg1, %c0_i32 : i32, i32, i32
  }
}

</mosaic_0001>

<bundles_post_ra>
// kernel: rnn_sublayer_forward.1
= control target key start
LH: loop header
LB: loop body
LE: loop exit
PB: predicated region body
PF: predicated region fallthrough
CT: control target
= control target key end

     0   :  { %v963_v1 = vmov 0.0   ;;  %vm44_vm0 = vcmask 130048   ;;  %vm964_vm1 = vmmov 0   ;;  %v965_v7 = vmov 0   ;;  %s1298_s0 = inlined_call_operand.vmem [shape: bf16[2,8,16], index: 0, kind: input, shape index: {}]   ;;  %s1299_s1 = inlined_call_operand.vmem [shape: f32[2,128], index: 1, kind: input, shape index: {}]   ;;  %s1300_s2 = inlined_call_operand.vmem [shape: bf16[16,128], index: 2, kind: input, shape index: {}]   ;;  %s1301_s3 = inlined_call_operand.vmem [shape: f32[1,128], index: 3, kind: input, shape index: {}]   ;;  %s1302_s4 = inlined_call_operand.vmem [shape: bf16[128,256], index: 4, kind: input, shape index: {}]   ;;  %s1303_s5 = inlined_call_operand.hbm [shape: f32[2,8,128], index: 5, kind: output, shape index: {}]  }
   0x1   :  { %v914_v0 = vld [vmem:[%s1300_s2] sm:$0xff]   ;;  %816 = vmatprep.subr.bf16.mxu0 %v963_v1  ;;  %822 = vmatprep.subr.bf16.mxu1 %v963_v1  ;;  %v1027_v6 = vld [vmem:[%s1302_s4 + $0x14] ss:$8 sps:$4 sm:$0xff]   ;;  %v1036_v8 = vld [vmem:[%s1302_s4 + $0x10] ss:$8 sps:$4 sm:$0xff]  }
   0x2   :  { %v31_v2 = vld [vmem:[%s1298_s0] sm:$0xf]  ;;  %v758_v3 = vld [vmem:[%s1298_s0 + $0x4] sm:$0xf]  ;;  %817 = vmatpush3.bf16.msra.mxu0 %v914_v0  ;;  %823 = vmatpush3.bf16.msra.mxu1 %v914_v0  ;;  %v1059_v11 = vld [vmem:[%s1302_s4 + $0x34] ss:$8 sps:$4 sm:$0xff]  }
   0x3   :  { %v1013_v4 = vld [vmem:[%s1302_s4] ss:$8 sps:$4 sm:$0xff]   ;;  %818 = vmatprep.mubr.msk.bf16.mxu0 %vm964_vm1, %v963_v1  ;;  %824 = vmatprep.mubr.msk.bf16.mxu1 %vm964_vm1, %v963_v1  ;;  %v1022_v5 = vld [vmem:[%s1302_s4 + $0x4] ss:$8 sps:$4 sm:$0xff]  }
   0x4   :  { %828 = vmatprep.subr.bf16.mxu1 %v963_v1  ;;  %238 = vmatprep.subr.bf16.mxu0 %v1022_v5  ;;  %v1043_v9 = vld [vmem:[%s1302_s4 + $0x24] ss:$8 sps:$4 sm:$0xff]   ;;  %v1052_v10 = vld [vmem:[%s1302_s4 + $0x20] ss:$8 sps:$4 sm:$0xff]  }
   0x5   :  { %819 = vmatmul.mubr.msk.bf16.vlgmr.msra.gmra.mrb[0].mxu0 %vm44_vm0, %v31_v2  ;;  %825 = vmatmul.mubr.msk.bf16.vlgmr.msra.gmra.mrb[0].mxu1 %vm44_vm0, %v758_v3  ;;  %v26_v12 = vld [vmem:[%s1299_s1] sm:$0x3] }
   0x6   :  { %270 = vmatprep.mubr.bf16.mxu0 %v965_v7  ;;  %239 = vmatpush1.bf16.msra.mxu0 %v1013_v4  ;;  %27 = vst [vmem:[#allocation3] sm:$0x3] %v26_v12 }
   0x7   :  { %829 = vmatpush3.bf16.msra.mxu1 %v1013_v4  ;;  %240 = vmatprep.subr.bf16.mxu0 %v1027_v6 }
   0x8   :  { %830 = vmatprep.subr.bf16.mxu1 %v963_v1  ;;  %844 = vmatprep.mubr.msk.bf16.mxu1 %vm964_vm1, %v963_v1 }
   0xa   :  { %241 = vmatpush1.bf16.msra.mxu0 %v1036_v8 }
   0xb   :  { %831 = vmatpush3.bf16.msra.mxu1 %v1036_v8  ;;  %242 = vmatprep.subr.bf16.mxu0 %v1043_v9 }
   0xc   :  { %832 = vmatprep.subr.bf16.mxu1 %v963_v1 }
   0xd   :  { %10 = vsyncpa [#allocation5], 0  ;;  %v1069_v13 = vld [vmem:[%s1302_s4 + $0x30] ss:$8 sps:$4 sm:$0xff]   ;;  %v1076_v14 = vld [vmem:[%s1302_s4 + $0x44] ss:$8 sps:$4 sm:$0xff]  }
   0xe   :  { %243 = vmatpush1.bf16.msra.mxu0 %v1052_v10  ;;  %v1083_v15 = vld [vmem:[%s1302_s4 + $0x40] ss:$8 sps:$4 sm:$0xff]   ;;  %v1090_v16 = vld [vmem:[%s1302_s4 + $0x54] ss:$8 sps:$4 sm:$0xff]   ;;  %v1097_v17 = vld [vmem:[%s1302_s4 + $0x50] ss:$8 sps:$4 sm:$0xff]  }
   0xf   :  { %833 = vmatpush3.bf16.msra.mxu1 %v1052_v10  ;;  %244 = vmatprep.subr.bf16.mxu0 %v1059_v11  ;;  %v1104_v18 = vld [vmem:[%s1302_s4 + $0x64] ss:$8 sps:$4 sm:$0xff]   ;;  %v1111_v19 = vld [vmem:[%s1302_s4 + $0x60] ss:$8 sps:$4 sm:$0xff]   ;;  %v1118_v20 = vld [vmem:[%s1302_s4 + $0x74] ss:$8 sps:$4 sm:$0xff]  }
  0x10   :  { %834 = vmatprep.subr.bf16.mxu1 %v963_v1  ;;  %v1125_v21 = vld [vmem:[%s1302_s4 + $0x70] ss:$8 sps:$4 sm:$0xff]   ;;  %v755_v24 = vld [vmem:[%s1301_s3] ss:$0 sm:$0xff]  ;;  %vm286_vm2 = vcmask 1041409   ;;  %s966_s3 = smov [#allocation4]  }
  0x11   :  { %v152_v22 = vld [vmem:[#allocation3] sm:$0x3]  ;;  %s744_s29 = sshll.u32 %s966_s3, 4  ;;  %s745_s29 = int_to_ptr.vmem [resolvable:$true] %s744_s29 }
  0x12   :  { %245 = vmatpush1.bf16.msra.mxu0 %v1069_v13  ;;  %v157_v23 = vpack.c.bf16 %v152_v22, %v152_v22  ;;  %s939_s30 = scalar_lea.vmem %s745_s29, 256  ;;  %p944_p1 = scmp.lt.s32.totalorder %s745_s29, %s745_s29 }
  0x13   :  { %835 = vmatpush3.bf16.msra.mxu1 %v1069_v13  ;;  %246 = vmatprep.subr.bf16.mxu0 %v1076_v14  ;;  %p940_p0 = scmp.ne.s32.totalorder %s745_s29, %s939_s30  ;;  %p945_p2 = scmp.lt.s32.totalorder %s939_s30, %s939_s30 }
  0x14   :  { %836 = vmatprep.subr.bf16.mxu1 %v963_v1 }
  0x15   :  { %p946_p3 = por %p945_p2, %p944_p1 }
  0x16   :  { %247 = vmatpush1.bf16.msra.mxu0 %v1083_v15 }
  0x17   :  { %837 = vmatpush3.bf16.msra.mxu1 %v1083_v15  ;;  %248 = vmatprep.subr.bf16.mxu0 %v1090_v16  ;;  %p947_p4 = pnand %p946_p3, %p940_p0 }
  0x18   :  { %838 = vmatprep.subr.bf16.mxu1 %v963_v1 }
  0x1a   :  { %249 = vmatpush1.bf16.msra.mxu0 %v1097_v17 }
  0x1b   :  { %839 = vmatpush3.bf16.msra.mxu1 %v1097_v17  ;;  %250 = vmatprep.subr.bf16.mxu0 %v1104_v18 }
  0x1c   :  { %840 = vmatprep.subr.bf16.mxu1 %v963_v1 }
  0x1e   :  { %251 = vmatpush1.bf16.msra.mxu0 %v1111_v19 }
  0x1f   :  { %841 = vmatpush3.bf16.msra.mxu1 %v1111_v19  ;;  %252 = vmatprep.subr.bf16.mxu0 %v1118_v20 }
  0x20   :  { %842 = vmatprep.subr.bf16.mxu1 %v963_v1 }
  0x22   :  { %253 = vmatpush1.bf16.msra.mxu0 %v1125_v21 }
  0x23   :  { %843 = vmatpush3.bf16.msra.mxu1 %v1125_v21  ;;  %366 = vmatprep.subr.bf16.mxu0 %v1022_v5 }
  0x24   :  { %848 = vmatprep.subr.bf16.mxu1 %v963_v1 }
  0x25   :  { %271 = vmatmul.mubr.bf16.vlgmr.msra.gmra.mrb[4].mxu0 %v157_v23 }
  0x26   :  { %367 = vmatpush1.bf16.msra.mxu0 %v1013_v4  ;;  %398 = vmatprep.mubr.bf16.mxu0 %v965_v7 }
  0x27   :  { %368 = vmatprep.subr.bf16.mxu0 %v1027_v6 }
  0x2a   :  { %369 = vmatpush1.bf16.msra.mxu0 %v1036_v8 }
  0x2b   :  { %370 = vmatprep.subr.bf16.mxu0 %v1043_v9 }
  0x2e   :  { %371 = vmatpush1.bf16.msra.mxu0 %v1052_v10 }
  0x2f   :  { %372 = vmatprep.subr.bf16.mxu0 %v1059_v11 }
  0x32   :  { %373 = vmatpush1.bf16.msra.mxu0 %v1069_v13 }
  0x33   :  { %374 = vmatprep.subr.bf16.mxu0 %v1076_v14 }
  0x36   :  { %375 = vmatpush1.bf16.msra.mxu0 %v1083_v15 }
  0x37   :  { %376 = vmatprep.subr.bf16.mxu0 %v1090_v16 }
  0x3a   :  { %377 = vmatpush1.bf16.msra.mxu0 %v1097_v17 }
  0x3b   :  { %378 = vmatprep.subr.bf16.mxu0 %v1104_v18 }
  0x3e   :  { %379 = vmatpush1.bf16.msra.mxu0 %v1111_v19 }
  0x3f   :  { %380 = vmatprep.subr.bf16.mxu0 %v1118_v20 }
  0x42   :  { %381 = vmatpush1.bf16.msra.mxu0 %v1125_v21 }
  0x43   :  { %493 = vmatprep.subr.bf16.mxu0 %v1022_v5 }
  0xd8   :  { %v82_v25 = vpop.f32.mrb[0].mxu0  ;;  %v128_v26 = vpop.f32.mrb[0].mxu1 }
  0xd9   :  { %v83_v27 = vadd.f32 %v755_v24, %v82_v25  ;;  %v129_v28 = vadd.f32 %v755_v24, %v128_v26  ;;  %v820_v29 = vpop.f32.mrb[1].mxu0  ;;  %v826_v30 = vpop.f32.mrb[1].mxu1 }
  0xda   :  { %v85_v31 = vpop.f32.mrb[2].mxu0  ;;  %v131_v32 = vpop.f32.mrb[2].mxu1 }
  0xdb   :  { %88 = vst [vmem:[#allocation2] sm:$0xff] %v83_v27  ;;  %135 = vst [vmem:[#allocation2 + $0x8] sm:$0xff] %v129_v28  ;;  %v821_v33 = vpop.f32.mrb[3].mxu0  ;;  %v827_v34 = vpop.f32.mrb[3].mxu1 }
  0xe2   :  { %v153_v35 = vld [vmem:[#allocation2] sm:$0x1]  ;;  %v154_v36 = vld [vmem:[#allocation2 + $0x8] sm:$0x1]  ;;  %v1163_v44 = vld [vmem:[#allocation2 + $0xa] sm:$0x1] }
  0xe3   :  { %v279_v37 = vpack.c.bf16 %v153_v35, %v153_v35  ;;  %v280_v38 = vpack.c.bf16 %v154_v36, %v154_v36  ;;  %v408_v49 = vpack.c.bf16 %v1163_v44, %v1163_v44  ;;  %v1171_v52 = vld [vmem:[#allocation2 + $0x2] sm:$0x1]  ;;  %v1192_v60 = vld [vmem:[#allocation2 + $0xc] sm:$0x1]  ;;  %v1198_v62 = vld [vmem:[#allocation2 + $0x4] sm:$0x1] }
  0xe4   :  { %v407_v54 = vpack.c.bf16 %v1171_v52, %v1171_v52  ;;  %v535_v61 = vpack.c.bf16 %v1192_v60, %v1192_v60  ;;  %v534_v63 = vpack.c.bf16 %v1198_v62, %v1198_v62  ;;  %v1219_v23 = vld [vmem:[#allocation2 + $0xe] sm:$0x1]  ;;  %v1225_v25 = vld [vmem:[#allocation2 + $0x6] sm:$0x1]  ;;  %v155_v32 = vld [vmem:[#allocation2 + $0x1] sm:$0x1] }
  0xe5   :  { %v283_v39 = vunpack.c.l.b16 %v279_v37  ;;  %v284_v40 = vunpack.c.l.b16 %v280_v38  ;;  %v412_v55 = vunpack.c.l.b16 %v408_v49  ;;  %v662_v24 = vpack.c.bf16 %v1219_v23, %v1219_v23  ;;  %v156_v38 = vld [vmem:[#allocation2 + $0x9] sm:$0x1] }
  0xe6   :  { %v411_v56 = vunpack.c.l.b16 %v407_v54  ;;  %v539_v0 = vunpack.c.l.b16 %v535_v61  ;;  %v538_v2 = vunpack.c.l.b16 %v534_v63  ;;  %v661_v26 = vpack.c.bf16 %v1225_v25, %v1225_v25 }
  0xe7   :  { %v285_v41 = vrot.slane %v284_v40, 7  ;;  %v413_v57 = vrot.slane %v412_v55, 7  ;;  %v666_v27 = vunpack.c.l.b16 %v662_v24 }
  0xe8   :  { %v540_v3 = vrot.slane %v539_v0, 7  ;;  %v665_v28 = vunpack.c.l.b16 %v661_v26  ;;  %v355_v26 = vld [vmem:[#allocation2 + $0xb] sm:$0x1] }
  0xe9   :  { %v287_v42 = vsel %vm286_vm2, %v285_v41, %v283_v39  ;;  %v414_v58 = vsel %vm286_vm2, %v413_v57, %v411_v56  ;;  %v667_v29 = vrot.slane %v666_v27, 7 }
  0xea   :  { %v288_v43 = vpack.c.b16 %v287_v42, %v287_v42  ;;  %v415_v59 = vpack.c.b16 %v414_v58, %v414_v58  ;;  %v541_v12 = vsel %vm286_vm2, %v540_v3, %v538_v2 }
  0xeb   :  { %v542_v22 = vpack.c.b16 %v541_v12, %v541_v12  ;;  %v668_v30 = vsel %vm286_vm2, %v667_v29, %v665_v28  ;;  %v354_v12 = vld [vmem:[#allocation2 + $0x3] sm:$0x1] }
  0xec   :  { %845 = vmatmul.mubr.bf16.vlgmr.msra.gmra.mrb[4].mxu1 %v288_v43  ;;  %v669_v31 = vpack.c.b16 %v668_v30, %v668_v30 }
  0xed   :  { %849 = vmatpush3.bf16.msra.mxu1 %v1013_v4  ;;  %864 = vmatprep.mubr.msk.bf16.mxu1 %vm964_vm1, %v963_v1 }
  0xee   :  { %850 = vmatprep.subr.bf16.mxu1 %v963_v1 }
  0xf1   :  { %851 = vmatpush3.bf16.msra.mxu1 %v1036_v8 }
  0xf2   :  { %852 = vmatprep.subr.bf16.mxu1 %v963_v1 }
  0xf5   :  { %853 = vmatpush3.bf16.msra.mxu1 %v1052_v10 }
  0xf6   :  { %854 = vmatprep.subr.bf16.mxu1 %v963_v1 }
  0xf8   :  { %v272_v45 = vpop.f32.mrb[4].mxu0 }
  0xf9   :  { %855 = vmatpush3.bf16.msra.mxu1 %v1069_v13  ;;  %v331_v46 = vrot.slane %v272_v45, 1  ;;  %v334_v47 = vadd.f32 %v272_v45, %v153_v35  ;;  %v1167_v48 = vpop.f32.mrb[5].mxu0 }
  0xfa   :  { %856 = vmatprep.subr.bf16.mxu1 %v963_v1  ;;  %v276_v50 = vpop.f32.mrb[6].mxu0  ;;  %v343_v34 = vrot.slane %v1167_v48, 1 }
  0xfb   :  { %v335_v51 = vadd.f32 %v331_v46, %v154_v36  ;;  %348 = vst [vmem:[#allocation4] sm:$0x1] %v334_v47  ;;  %v277_v53 = vpop.f32.mrb[7].mxu0 }
  0xfd   :  { %857 = vmatpush3.bf16.msra.mxu1 %v1083_v15  ;;  %349 = vst [vmem:[#allocation4 + $0x8] sm:$0x1] %v335_v51 }
  0xfe   :  { %858 = vmatprep.subr.bf16.mxu1 %v963_v1 }
 0x101   :  { %859 = vmatpush3.bf16.msra.mxu1 %v1097_v17 }
 0x102   :  { %860 = vmatprep.subr.bf16.mxu1 %v963_v1 }
 0x105   :  { %861 = vmatpush3.bf16.msra.mxu1 %v1111_v19 }
 0x106   :  { %862 = vmatprep.subr.bf16.mxu1 %v963_v1 }
 0x109   :  { %863 = vmatpush3.bf16.msra.mxu1 %v1125_v21 }
 0x10a   :  { %868 = vmatprep.subr.bf16.mxu1 %v963_v1 }
 0x10c   :  { %865 = vmatmul.mubr.bf16.vlgmr.msra.gmra.mrb[8].mxu1 %v415_v59 }
 0x10d   :  { %869 = vmatpush3.bf16.msra.mxu1 %v1013_v4  ;;  %884 = vmatprep.mubr.msk.bf16.mxu1 %vm964_vm1, %v963_v1 }
 0x10e   :  { %870 = vmatprep.subr.bf16.mxu1 %v963_v1 }
 0x111   :  { %871 = vmatpush3.bf16.msra.mxu1 %v1036_v8 }
 0x112   :  { %872 = vmatprep.subr.bf16.mxu1 %v963_v1 }
 0x115   :  { %873 = vmatpush3.bf16.msra.mxu1 %v1052_v10 }
 0x116   :  { %874 = vmatprep.subr.bf16.mxu1 %v963_v1 }
 0x119   :  { %875 = vmatpush3.bf16.msra.mxu1 %v1069_v13 }
 0x11a   :  { %876 = vmatprep.subr.bf16.mxu1 %v963_v1 }
 0x11d   :  { %877 = vmatpush3.bf16.msra.mxu1 %v1083_v15 }
 0x11e   :  { %878 = vmatprep.subr.bf16.mxu1 %v963_v1 }
 0x121   :  { %879 = vmatpush3.bf16.msra.mxu1 %v1097_v17 }
 0x122   :  { %880 = vmatprep.subr.bf16.mxu1 %v963_v1 }
 0x125   :  { %881 = vmatpush3.bf16.msra.mxu1 %v1111_v19 }
 0x126   :  { %882 = vmatprep.subr.bf16.mxu1 %v963_v1 }
 0x129   :  { %883 = vmatpush3.bf16.msra.mxu1 %v1125_v21 }
 0x12a   :  { %888 = vmatprep.subr.bf16.mxu1 %v963_v1 }
 0x12c   :  { %885 = vmatmul.mubr.bf16.vlgmr.msra.gmra.mrb[12].mxu1 %v542_v22 }
 0x12d   :  { %889 = vmatpush3.bf16.msra.mxu1 %v1013_v4  ;;  %904 = vmatprep.mubr.msk.bf16.mxu1 %vm964_vm1, %v963_v1 }
 0x12e   :  { %890 = vmatprep.subr.bf16.mxu1 %v963_v1 }
 0x131   :  { %891 = vmatpush3.bf16.msra.mxu1 %v1036_v8 }
 0x132   :  { %892 = vmatprep.subr.bf16.mxu1 %v963_v1 }
 0x135   :  { %893 = vmatpush3.bf16.msra.mxu1 %v1052_v10 }
 0x136   :  { %894 = vmatprep.subr.bf16.mxu1 %v963_v1 }
 0x139   :  { %895 = vmatpush3.bf16.msra.mxu1 %v1069_v13 }
 0x13a   :  { %896 = vmatprep.subr.bf16.mxu1 %v963_v1 }
 0x13d   :  { %897 = vmatpush3.bf16.msra.mxu1 %v1083_v15 }
 0x13e   :  { %898 = vmatprep.subr.bf16.mxu1 %v963_v1 }
 0x141   :  { %899 = vmatpush3.bf16.msra.mxu1 %v1097_v17 }
 0x142   :  { %900 = vmatprep.subr.bf16.mxu1 %v963_v1 }
 0x145   :  { %901 = vmatpush3.bf16.msra.mxu1 %v1111_v19 }
 0x146   :  { %902 = vmatprep.subr.bf16.mxu1 %v963_v1 }
 0x149   :  { %903 = vmatpush3.bf16.msra.mxu1 %v1125_v21 }
 0x14c   :  { %905 = vmatmul.mubr.bf16.vlgmr.msra.gmra.mrb[16].mxu1 %v669_v31 }
 0x1bf   :  { %v324_v33 = vpop.f32.mrb[4].mxu1 }
 0x1c0   :  { %v337_v35 = vrot.slane %v324_v33, 1  ;;  %v340_v36 = vadd.f32 %v324_v33, %v155_v32  ;;  %v846_v37 = vpop.f32.mrb[5].mxu1 }
 0x1c1   :  { %v327_v39 = vpop.f32.mrb[6].mxu1 }
 0x1c2   :  { %v341_v40 = vadd.f32 %v337_v35, %v156_v38  ;;  %v346_v41 = vadd.f32 %v340_v36, %v1167_v48  ;;  %v847_v42 = vpop.f32.mrb[7].mxu1 }
 0x1c4   :  { %v347_v1 = vadd.f32 %v343_v34, %v341_v40  ;;  %350 = vst [vmem:[#allocation4 + $0x1] sm:$0x1] %v346_v41  ;;  %v356_v43 = vpack.c.bf16 %v346_v41, %v346_v41 }
 0x1c6   :  { %351 = vst [vmem:[#allocation4 + $0x9] sm:$0x1] %v347_v1  ;;  %v357_v45 = vpack.c.bf16 %v347_v1, %v347_v1  ;;  %v360_v47 = vunpack.c.l.b16 %v356_v43 }
 0x1c8   :  { %v361_v46 = vunpack.c.l.b16 %v357_v45 }
 0x1ca   :  { %v362_v49 = vrot.slane %v361_v46, 7 }
 0x1cc   :  { %v363_v50 = vsel %vm286_vm2, %v362_v49, %v360_v47  ;;  %v608_v47 = vld [vmem:[#allocation2 + $0x7] sm:$0x1] }
 0x1cd   :  { %v364_v51 = vpack.c.b16 %v363_v50, %v363_v50  ;;  %v609_v50 = vld [vmem:[#allocation2 + $0xf] sm:$0x1] }
 0x1cf   :  { %399 = vmatmul.mubr.bf16.vlgmr.msra.gmra.mrb[8].mxu0 %v364_v51 }
 0x1d0   :  { %494 = vmatpush1.bf16.msra.mxu0 %v1013_v4  ;;  %525 = vmatprep.mubr.bf16.mxu0 %v965_v7 }
 0x1d1   :  { %495 = vmatprep.subr.bf16.mxu0 %v1027_v6 }
 0x1d4   :  { %496 = vmatpush1.bf16.msra.mxu0 %v1036_v8 }
 0x1d5   :  { %497 = vmatprep.subr.bf16.mxu0 %v1043_v9 }
 0x1d8   :  { %498 = vmatpush1.bf16.msra.mxu0 %v1052_v10 }
 0x1d9   :  { %499 = vmatprep.subr.bf16.mxu0 %v1059_v11 }
 0x1dc   :  { %500 = vmatpush1.bf16.msra.mxu0 %v1069_v13 }
 0x1dd   :  { %501 = vmatprep.subr.bf16.mxu0 %v1076_v14 }
 0x1df   :  { %v451_v48 = vpop.f32.mrb[8].mxu1 }
 0x1e0   :  { %v866_v53 = vpop.f32.mrb[9].mxu1  ;;  %502 = vmatpush1.bf16.msra.mxu0 %v1083_v15  ;;  %v464_v3 = vrot.slane %v451_v48, 1  ;;  %v467_v22 = vadd.f32 %v451_v48, %v354_v12 }
 0x1e1   :  { %v454_v54 = vpop.f32.mrb[10].mxu1  ;;  %503 = vmatprep.subr.bf16.mxu0 %v1090_v16 }
 0x1e2   :  { %v867_v55 = vpop.f32.mrb[11].mxu1  ;;  %v468_v30 = vadd.f32 %v464_v3, %v355_v26 }
 0x1e4   :  { %504 = vmatpush1.bf16.msra.mxu0 %v1097_v17 }
 0x1e5   :  { %505 = vmatprep.subr.bf16.mxu0 %v1104_v18 }
 0x1e8   :  { %506 = vmatpush1.bf16.msra.mxu0 %v1111_v19 }
 0x1e9   :  { %507 = vmatprep.subr.bf16.mxu0 %v1118_v20 }
 0x1ec   :  { %508 = vmatpush1.bf16.msra.mxu0 %v1125_v21 }
 0x1ed   :  { %620 = vmatprep.subr.bf16.mxu0 %v1022_v5 }
 0x1ff   :  { %v578_v56 = vpop.f32.mrb[12].mxu1 }
 0x200   :  { %v886_v57 = vpop.f32.mrb[13].mxu1 }
 0x201   :  { %v581_v58 = vpop.f32.mrb[14].mxu1 }
 0x202   :  { %v887_v59 = vpop.f32.mrb[15].mxu1 }
 0x21f   :  { %v1257_v61 = vpop.f32.mrb[16].mxu1 }
 0x220   :  { %v906_v63 = vpop.f32.mrb[17].mxu1  ;;  %v718_v46 = vrot.slane %v1257_v61, 1 }
 0x221   :  { %v708_v0 = vpop.f32.mrb[18].mxu1 }
 0x222   :  { %v907_v2 = vpop.f32.mrb[19].mxu1  ;;  %v722_v54 = vadd.f32 %v718_v46, %v609_v50 }
 0x2a2   :  { %v400_v24 = vpop.f32.mrb[8].mxu0 }
 0x2a3   :  { %v458_v27 = vrot.slane %v400_v24, 1  ;;  %v461_v28 = vadd.f32 %v400_v24, %v1171_v52  ;;  %v402_v29 = vpop.f32.mrb[9].mxu0 }
 0x2a4   :  { %v470_v5 = vrot.slane %v402_v29, 1  ;;  %v473_v31 = vadd.f32 %v467_v22, %v402_v29  ;;  %v404_v32 = vpop.f32.mrb[10].mxu0 }
 0x2a5   :  { %v462_v33 = vadd.f32 %v458_v27, %v1163_v44  ;;  %475 = vst [vmem:[#allocation4 + $0x2] sm:$0x1] %v461_v28  ;;  %v405_v34 = vpop.f32.mrb[11].mxu0 }
 0x2a6   :  { %v474_v35 = vadd.f32 %v470_v5, %v468_v30  ;;  %477 = vst [vmem:[#allocation4 + $0x3] sm:$0x1] %v473_v31  ;;  %v483_v36 = vpack.c.bf16 %v473_v31, %v473_v31 }
 0x2a7   :  { %476 = vst [vmem:[#allocation4 + $0xa] sm:$0x1] %v462_v33 }
 0x2a8   :  { %478 = vst [vmem:[#allocation4 + $0xb] sm:$0x1] %v474_v35  ;;  %v484_v37 = vpack.c.bf16 %v474_v35, %v474_v35  ;;  %v487_v39 = vunpack.c.l.b16 %v483_v36 }
 0x2aa   :  { %v488_v38 = vunpack.c.l.b16 %v484_v37 }
 0x2ac   :  { %v489_v40 = vrot.slane %v488_v38, 7 }
 0x2ae   :  { %v490_v52 = vsel %vm286_vm2, %v489_v40, %v487_v39 }
 0x2af   :  { %v491_v41 = vpack.c.b16 %v490_v52, %v490_v52 }
 0x2b1   :  { %526 = vmatmul.mubr.bf16.vlgmr.msra.gmra.mrb[12].mxu0 %v491_v41 }
 0x2b2   :  { %621 = vmatpush1.bf16.msra.mxu0 %v1013_v4  ;;  %652 = vmatprep.mubr.bf16.mxu0 %v965_v7  ;;  %v591_v4 = vrot.slane %v578_v56, 1 }
 0x2b3   :  { %622 = vmatprep.subr.bf16.mxu0 %v1027_v6  ;;  %v481_v6 = vld [vmem:[#allocation2 + $0x5] sm:$0x1] }
 0x2b4   :  { %v594_v7 = vadd.f32 %v578_v56, %v481_v6 }
 0x2b6   :  { %623 = vmatpush1.bf16.msra.mxu0 %v1036_v8 }
 0x2b7   :  { %624 = vmatprep.subr.bf16.mxu0 %v1043_v9  ;;  %v482_v9 = vld [vmem:[#allocation2 + $0xd] sm:$0x1] }
 0x2ba   :  { %625 = vmatpush1.bf16.msra.mxu0 %v1052_v10 }
 0x2bb   :  { %626 = vmatprep.subr.bf16.mxu0 %v1059_v11 }
 0x2be   :  { %627 = vmatpush1.bf16.msra.mxu0 %v1069_v13 }
 0x2bf   :  { %628 = vmatprep.subr.bf16.mxu0 %v1076_v14  ;;  %v595_v14 = vadd.f32 %v591_v4, %v482_v9 }
 0x2c2   :  { %629 = vmatpush1.bf16.msra.mxu0 %v1083_v15 }
 0x2c3   :  { %630 = vmatprep.subr.bf16.mxu0 %v1090_v16 }
 0x2c6   :  { %631 = vmatpush1.bf16.msra.mxu0 %v1097_v17 }
 0x2c7   :  { %632 = vmatprep.subr.bf16.mxu0 %v1104_v18 }
 0x2ca   :  { %633 = vmatpush1.bf16.msra.mxu0 %v1111_v19 }
 0x2cb   :  { %634 = vmatprep.subr.bf16.mxu0 %v1118_v20 }
 0x2ce   :  { %635 = vmatpush1.bf16.msra.mxu0 %v1125_v21 }
 0x384   :  { %v527_v8 = vpop.f32.mrb[12].mxu0 }
 0x385   :  { %v585_v10 = vrot.slane %v527_v8, 1  ;;  %v588_v11 = vadd.f32 %v527_v8, %v1198_v62  ;;  %v529_v13 = vpop.f32.mrb[13].mxu0 }
 0x386   :  { %v597_v15 = vrot.slane %v529_v13, 1  ;;  %v600_v16 = vadd.f32 %v594_v7, %v529_v13  ;;  %v531_v17 = vpop.f32.mrb[14].mxu0 }
 0x387   :  { %v589_v18 = vadd.f32 %v585_v10, %v1192_v60  ;;  %602 = vst [vmem:[#allocation4 + $0x4] sm:$0x1] %v588_v11  ;;  %v532_v19 = vpop.f32.mrb[15].mxu0  ;;  %v721_v60 = vadd.f32 %v1257_v61, %v608_v47 }
 0x388   :  { %v601_v20 = vadd.f32 %v597_v15, %v595_v14  ;;  %604 = vst [vmem:[#allocation4 + $0x5] sm:$0x1] %v600_v16  ;;  %v610_v21 = vpack.c.bf16 %v600_v16, %v600_v16 }
 0x389   :  { %603 = vst [vmem:[#allocation4 + $0xc] sm:$0x1] %v589_v18 }
 0x38a   :  { %605 = vst [vmem:[#allocation4 + $0xd] sm:$0x1] %v601_v20  ;;  %v611_v44 = vpack.c.bf16 %v601_v20, %v601_v20  ;;  %v614_v1 = vunpack.c.l.b16 %v610_v21 }
 0x38c   :  { %v615_v42 = vunpack.c.l.b16 %v611_v44 }
 0x38e   :  { %v616_v43 = vrot.slane %v615_v42, 7 }
 0x390   :  { %v617_v62 = vsel %vm286_vm2, %v616_v43, %v614_v1 }
 0x391   :  { %v618_v45 = vpack.c.b16 %v617_v62, %v617_v62 }
 0x393   :  { %653 = vmatmul.mubr.bf16.vlgmr.msra.gmra.mrb[16].mxu0 %v618_v45 }
 0x466   :  { %v654_v49 = vpop.f32.mrb[16].mxu0 }
 0x467   :  { %v712_v51 = vrot.slane %v654_v49, 1  ;;  %v715_v48 = vadd.f32 %v654_v49, %v1225_v25  ;;  %v656_v53 = vpop.f32.mrb[17].mxu0 }
 0x468   :  { %v724_v55 = vrot.slane %v656_v53, 1  ;;  %v727_v56 = vadd.f32 %v721_v60, %v656_v53  ;;  %v658_v57 = vpop.f32.mrb[18].mxu0 }
 0x469   :  { %v716_v58 = vadd.f32 %v712_v51, %v1219_v23  ;;  %729 = vst [vmem:[#allocation4 + $0x6] sm:$0x1] %v715_v48  ;;  %v659_v59 = vpop.f32.mrb[19].mxu0 }
 0x46a   :  { %v728_v63 = vadd.f32 %v724_v55, %v722_v54  ;;  %731 = vst [vmem:[#allocation4 + $0x7] sm:$0x1] %v727_v56 }
 0x46b   :  { %730 = vst [vmem:[#allocation4 + $0xe] sm:$0x1] %v716_v58 }
 0x46c   :  { %732 = vst [vmem:[#allocation4 + $0xf] sm:$0x1] %v728_v63  ;;  %v735_v61 = vrot.slane %v728_v63, 7 }
 0x46d   :  { %950 = shalt.err (!%p947_p4)
}
 0x46e   :  { %s951_s8 = scalar_lea.hbm %s1303_s5, 256 }
 0x46f   :  { %p952_p5 = scmp.ne.s32.totalorder %s1303_s5, %s951_s8  ;;  %p955_p6 = scmp.lt.u32.totalorder %s951_s8, %s1303_s5 }
 0x471   :  { %p957_p7 = pnand %p955_p6, %p952_p5 }
 0x473   :  { %960 = shalt.err (!%p957_p7)
}
 0x474   :  { %s967_s13 = smov 128   ;;  %s968_s14 = smov 8   ;;  %v736_v23 = vsel %vm286_vm2, %v735_v61, %v727_v56 }
 0x475   :  { %750 = dma.vmem_to_hbm [thread:$0]  %s745_s29, 256, %s1303_s5, [#allocation5], %s967_s13, %s967_s13, %s968_s14   ;;  %738 = vst [vmem:[#allocation3] sm:$0x3] %v736_v23 }
 0x476   :  { %961 = dma.done.wait [#allocation5], 256  }
 0x477   :  { %962 = vsyncadd [#allocation5], 4294967040 }
 0x478   :  { %754 = vsyncpa [#allocation5], 1 }

</bundles_post_ra>
